<compile_context>
chip_gen: v6e
topology: v6e:2x2x1
jax: 0.10.0
libtpu: 0.0.40
codegen_flags: <defaults>
</compile_context>

<pallas_src>
import functools

import jax
import jax.numpy as jnp
from jax.experimental import pallas as pl
from jax.experimental.pallas import tpu as pltpu


# ---------------------------------------------------------------------------
# Per-chip VMEM limits / tile budgets
# ---------------------------------------------------------------------------

@functools.lru_cache(maxsize=None)
def _physical_vmem_bytes() -> int:
    try:
        info = pltpu.get_tpu_info()
        v = int(getattr(info, "vmem_capacity_bytes", 0) or 0)
        if v > 0:
            return v
    except Exception:
        pass
    return 64 * 1024 * 1024      # conservative default (v7x-sized VMEM)


@functools.lru_cache(maxsize=None)
def _vmem_limit_bytes() -> int:
    # ~75% of physical VMEM, capped at 96 MiB: v5e/v6e (128 MiB) -> 96 MiB,
    # v7x (64 MiB) -> 48 MiB.  Never blindly use the 128-MiB tuning on v7x.
    return min((_physical_vmem_bytes() * 3) // 4, 96 * 1024 * 1024)


@functools.lru_cache(maxsize=None)
def _tile_budget_bytes() -> int:
    # Leave ~15% headroom under the scoped limit for Mosaic internal scratch.
    return int(_vmem_limit_bytes() * 0.85)


# ---------------------------------------------------------------------------
# Tiling helpers
# ---------------------------------------------------------------------------

def _sublane_quantum(itemsize: int) -> int:
    """Channel-tile alignment: 8 for 4-byte dtypes, 16 for bf16, 32 for int8."""
    return 8 * max(1, 4 // itemsize)


def _channel_tile_candidates(C: int, quantum: int):
    """Divisors of C that are multiples of `quantum`, plus C itself (desc)."""
    cands = {d for d in range(quantum, C + 1, quantum) if C % d == 0}
    cands.add(C)
    return sorted(cands, reverse=True)


def _spatial_tile_candidates(S: int):
    """Divisors of S that are multiples of 128 (lane-aligned), plus S (desc)."""
    cands = {d for d in range(128, S + 1, 128) if S % d == 0}
    cands.add(S)
    return sorted(cands, reverse=True)


def _per_element_vmem_bytes(itemsize: int) -> int:
    # 2x double-buffered input block + 2x double-buffered output block in the
    # HBM dtype, plus ~2 fp32 slabs of headroom for the in-kernel upcast /
    # intermediate values.  Conservative (also counted for fp32 inputs).
    return 4 * itemsize + 2 * 4


def _pick_channel_tile(C: int, itemsize: int, per_channel_elems: int,
                       budget: int, target_steps: int = 4):
    """Largest channel tile that (a) fits the VMEM budget and (b) keeps enough
    grid steps for DMA/compute overlap and v7x megacore sharding.  Returns
    None if even the smallest aligned tile does not fit (two-pass fallback)."""
    cands = _channel_tile_candidates(C, _sublane_quantum(itemsize))
    per_elem = _per_element_vmem_bytes(itemsize)
    fitting = [c for c in cands if c * per_channel_elems * per_elem <= budget]
    if not fitting:
        return None
    for steps in (target_steps, 2, 1):
        for c in fitting:                       # descending order
            if C // c >= steps:
                return c
    return fitting[0]


def _pick_eval_tiles(N: int, C: int, S: int, itemsize: int, budget: int,
                     target_steps: int = 4):
    """(TC, TS) for the streaming apply / reduction kernels.

    Lane-dense first: maximize TS (unmasked full-width stores + long contiguous
    DMA runs), then pick TC, preferring enough total grid steps for pipelining
    and megacore sharding."""
    c_cands = _channel_tile_candidates(C, _sublane_quantum(itemsize))
    s_cands = _spatial_tile_candidates(S)
    per_elem = _per_element_vmem_bytes(itemsize)
    tc_min = c_cands[-1]
    TS = next((s for s in s_cands if N * tc_min * s * per_elem <= budget),
              s_cands[-1])
    fitting = [c for c in c_cands if N * c * TS * per_elem <= budget] or [tc_min]
    s_steps = S // TS
    for steps in (target_steps, 2, 1):
        for c in fitting:
            if (C // c) * s_steps >= steps:
                return c, TS
    return fitting[0], TS


# ---------------------------------------------------------------------------
# Kernels
# ---------------------------------------------------------------------------

def _bn_train_kernel(x_ref, w_ref, b_ref, o_ref, mean_ref, var_ref, *, eps):
    """Fused batch-stats + normalize for one channel tile.

    x_ref : (N, TC, S)  input slab (S = H*W, lane-dense)
    w_ref : (TC, 1)     affine weight (fp32)
    b_ref : (TC, 1)     affine bias   (fp32)
    o_ref : (N, TC, S)  normalized output (x dtype)
    mean_ref, var_ref : (TC, 1) per-channel batch mean / biased variance (fp32)
    """
    x = x_ref[...].astype(jnp.float32)
    inv_count = 1.0 / (x.shape[0] * x.shape[2])           # 1 / (N * H * W)

    # One-pass moments: reduce the batch axis first (cheap vreg adds), then
    # the lane-dense spatial axis (XLU).  No full `centered` temporary is
    # materialized, so only one fp32 slab is live.
    s1 = jnp.sum(jnp.sum(x, axis=0), axis=1, keepdims=True)          # (TC, 1)
    s2 = jnp.sum(jnp.sum(x * x, axis=0), axis=1, keepdims=True)      # (TC, 1)
    mean = s1 * inv_count
    var = jnp.maximum(s2 * inv_count - mean * mean, 0.0)  # clamp fp32 cancellation

    inv_std = jax.lax.rsqrt(var + eps)
    scale = w_ref[...] * inv_std                                       # (TC, 1)
    shift = b_ref[...] - mean * scale                                  # (TC, 1)

    # Single FMA per element for the normalize/affine step.
    o_ref[...] = (x * scale[None, :, :] + shift[None, :, :]).astype(o_ref.dtype)
    mean_ref[...] = mean
    var_ref[...] = var


def _bn_sumsq_kernel(x_ref, sum_ref, sumsq_ref):
    """Stage-1 of the two-pass fallback: accumulate sum(x), sum(x*x) per channel."""
    @pl.when(pl.program_id(1) == 0)
    def _():
        sum_ref[...] = jnp.zeros_like(sum_ref)
        sumsq_ref[...] = jnp.zeros_like(sumsq_ref)
    x = x_ref[...].astype(jnp.float32)
    sum_ref[...] += jnp.sum(jnp.sum(x, axis=0), axis=1, keepdims=True)
    sumsq_ref[...] += jnp.sum(jnp.sum(x * x, axis=0), axis=1, keepdims=True)


def _bn_apply_kernel(x_ref, scale_ref, shift_ref, o_ref):
    """out = x * scale + shift  (scale/shift fold mean/var/weight/bias)."""
    # TODO(synk): on v6e/v7x with bf16 inputs this could compute natively in
    # bf16 (native bf16 VPU) to halve vreg footprint; fp32 kept for v5e compat.
    x = x_ref[...].astype(jnp.float32)
    o_ref[...] = (x * scale_ref[...][None, :, :]
                  + shift_ref[...][None, :, :]).astype(o_ref.dtype)


# ---------------------------------------------------------------------------
# pallas_call wrappers
# ---------------------------------------------------------------------------

def _apply_scale_shift(x3, scale, shift, budget):
    """Streaming per-channel FMA over x3 (N, C, S); scale/shift are (C, 1) fp32."""
    N, C, S = x3.shape
    TC, TS = _pick_eval_tiles(N, C, S, x3.dtype.itemsize, budget)
    return pl.pallas_call(
        _bn_apply_kernel,
        out_shape=jax.ShapeDtypeStruct((N, C, S), x3.dtype),
        grid=(C // TC, S // TS),
        in_specs=[
            pl.BlockSpec((N, TC, TS), lambda c, s: (0, c, s)),
            pl.BlockSpec((TC, 1), lambda c, s: (c, 0)),
            pl.BlockSpec((TC, 1), lambda c, s: (c, 0)),
        ],
        out_specs=pl.BlockSpec((N, TC, TS), lambda c, s: (0, c, s)),
        compiler_params=pltpu.CompilerParams(
            dimension_semantics=("parallel", "parallel"),
            vmem_limit_bytes=_vmem_limit_bytes(),
        ),
    )(x3, scale, shift)


def _batch_stats_two_pass(x3, budget):
    """Two-pass fallback stage 1: per-channel mean & biased var of x3 (N, C, S)."""
    N, C, S = x3.shape
    TC, TS = _pick_eval_tiles(N, C, S, x3.dtype.itemsize, budget)
    s1, s2 = pl.pallas_call(
        _bn_sumsq_kernel,
        out_shape=(jax.ShapeDtypeStruct((C, 1), jnp.float32),
                   jax.ShapeDtypeStruct((C, 1), jnp.float32)),
        grid=(C // TC, S // TS),
        in_specs=[pl.BlockSpec((N, TC, TS), lambda c, s: (0, c, s))],
        out_specs=(pl.BlockSpec((TC, 1), lambda c, s: (c, 0)),
                   pl.BlockSpec((TC, 1), lambda c, s: (c, 0))),
        compiler_params=pltpu.CompilerParams(
            dimension_semantics=("parallel", "arbitrary"),   # spatial = reduction
            vmem_limit_bytes=_vmem_limit_bytes(),
        ),
    )(x3)
    inv_count = 1.0 / (N * S)
    mean = (s1 * inv_count).reshape(C)
    var = jnp.maximum((s2 * inv_count).reshape(C) - mean * mean, 0.0)
    return mean, var


# ---------------------------------------------------------------------------
# Jitted forward functions (reshape + pallas_call + running-stat EMA)
# ---------------------------------------------------------------------------

def _bn_train_forward(x, weight, bias, running_mean, running_var, momentum, *, eps):
    """x: (N, C, H, W) -> (out, new_running_mean, new_running_var)."""
    N, C, H, W = x.shape
    S = H * W
    x3 = x.reshape(N, C, S)                       # free view, no transpose
    budget = _tile_budget_bytes()

    TC = _pick_channel_tile(C, x3.dtype.itemsize, N * S, budget)
    if TC is not None:
        # Fused single-pass path: whole (N, TC, S) slab resident per step.
        kernel = functools.partial(_bn_train_kernel, eps=eps)
        out3, mean2d, var2d = pl.pallas_call(
            kernel,
            out_shape=(
                jax.ShapeDtypeStruct((N, C, S), x3.dtype),
                jax.ShapeDtypeStruct((C, 1), jnp.float32),
                jax.ShapeDtypeStruct((C, 1), jnp.float32),
            ),
            grid=(C // TC,),
            in_specs=[
                pl.BlockSpec((N, TC, S), lambda c: (0, c, 0)),
                pl.BlockSpec((TC, 1), lambda c: (c, 0)),
                pl.BlockSpec((TC, 1), lambda c: (c, 0)),
            ],
            out_specs=(
                pl.BlockSpec((N, TC, S), lambda c: (0, c, 0)),
                pl.BlockSpec((TC, 1), lambda c: (c, 0)),
                pl.BlockSpec((TC, 1), lambda c: (c, 0)),
            ),
            compiler_params=pltpu.CompilerParams(
                dimension_semantics=("parallel",),
                vmem_limit_bytes=_vmem_limit_bytes(),
            ),
        )(x3,
          weight.reshape(C, 1).astype(jnp.float32),
          bias.reshape(C, 1).astype(jnp.float32))
        mean = mean2d.reshape(C)
        var = var2d.reshape(C)
    else:
        # Two-pass fallback (huge N*H*W per channel, e.g. v7x's 64 MiB VMEM):
        # tiled sum/sumsq reduction, then the streaming FMA apply kernel.
        mean, var = _batch_stats_two_pass(x3, budget)
        inv_std = jax.lax.rsqrt(var + eps)
        scale_vec = weight.astype(jnp.float32) * inv_std
        shift_vec = bias.astype(jnp.float32) - mean * scale_vec
        out3 = _apply_scale_shift(x3, scale_vec.reshape(C, 1),
                                  shift_vec.reshape(C, 1), budget)

    momentum = momentum.astype(jnp.float32)
    new_rm = (1.0 - momentum) * running_mean.astype(jnp.float32) + momentum * mean
    # Reference module updates running_var with the BIASED batch variance
    # (torch.var(unbiased=False)); real nn.BatchNorm2d would use the unbiased one.
    new_rv = (1.0 - momentum) * running_var.astype(jnp.float32) + momentum * var
    return out3.reshape(N, C, H, W), new_rm, new_rv


def _bn_eval_forward(x, running_mean, running_var, weight, bias, *, eps):
    """x: (N, C, H, W) -> out, normalized with the provided running stats."""
    N, C, H, W = x.shape
    S = H * W
    x3 = x.reshape(N, C, S)

    # Fold running stats + affine params into per-channel scale/shift so the
    # kernel does a single FMA per element.
    inv_std = jax.lax.rsqrt(running_var.astype(jnp.float32) + eps)
    scale_vec = weight.astype(jnp.float32) * inv_std
    shift_vec = bias.astype(jnp.float32) - running_mean.astype(jnp.float32) * scale_vec
    out3 = _apply_scale_shift(x3, scale_vec.reshape(C, 1), shift_vec.reshape(C, 1),
                              _tile_budget_bytes())
    return out3.reshape(N, C, H, W)


# ---------------------------------------------------------------------------
# Wrapper module (mirrors the reference BatchNorm2d)
# ---------------------------------------------------------------------------

class BatchNorm2d:
    def __init__(self, num_features: int, eps: float = 1e-5, momentum: float = 0.1):
        self.num_features = num_features
        self.eps = eps
        self.momentum = momentum
        self.weight = jnp.ones((num_features,), jnp.float32)
        self.bias = jnp.zeros((num_features,), jnp.float32)
        self.running_mean = jnp.zeros((num_features,), jnp.float32)
        self.running_var = jnp.ones((num_features,), jnp.float32)
        # Host-side Python int: avoids a blocking device->host sync per step
        # when momentum=None (cumulative moving average).
        self.num_batches_tracked = 0
        self.training = True
        self._train_fn = jax.jit(functools.partial(_bn_train_forward, eps=eps))
        self._eval_fn = jax.jit(functools.partial(_bn_eval_forward, eps=eps))

    def __call__(self, x):
        """x: (N, C, H, W) -> (N, C, H, W)"""
        N, C, H, W = x.shape
        assert C == self.num_features

        if self.training:
            if self.momentum is None:
                momentum = 1.0 / (self.num_batches_tracked + 1)
            else:
                momentum = self.momentum
            out, self.running_mean, self.running_var = self._train_fn(
                x, self.weight, self.bias, self.running_mean, self.running_var,
                jnp.asarray(momentum, jnp.float32))
            self.num_batches_tracked += 1
            return out
        return self._eval_fn(x, self.running_mean, self.running_var,
                             self.weight, self.bias)


# ---------------------------------------------------------------------------
# Pure-JAX references (verification)
# ---------------------------------------------------------------------------

def _ref_batchnorm_train(x, weight, bias, eps):
    xf = x.astype(jnp.float32)
    mean = jnp.mean(xf, axis=(0, 2, 3), keepdims=True)
    var = jnp.mean((xf - mean) ** 2, axis=(0, 2, 3), keepdims=True)
    w = weight.reshape(1, -1, 1, 1)
    b = bias.reshape(1, -1, 1, 1)
    return (xf - mean) / jnp.sqrt(var + eps) * w + b


def _ref_batchnorm_eval(x, rm, rv, weight, bias, eps):
    xf = x.astype(jnp.float32)
    mean = rm.reshape(1, -1, 1, 1)
    var = rv.reshape(1, -1, 1, 1)
    w = weight.reshape(1, -1, 1, 1)
    b = bias.reshape(1, -1, 1, 1)
    return (xf - mean) / jnp.sqrt(var + eps) * w + b


# ---------------------------------------------------------------------------

if __name__ == "__main__":
    key = jax.random.PRNGKey(0)

    # --- test 1: fp32, small shape, training + eval ---
    N, C, H, W = 2, 4, 16, 16
    x = jax.random.normal(key, (N, C, H, W), dtype=jnp.float32) * 2.0 + 0.5

    bn = BatchNorm2d(num_features=C)
    bn.weight = jnp.arange(1, C + 1, dtype=jnp.float32) * 0.5
    bn.bias = jnp.arange(C, dtype=jnp.float32) * 0.1

    bn.training = True
    y_train = jax.block_until_ready(bn(x))
    y_train_ref = _ref_batchnorm_train(x, bn.weight, bn.bias, bn.eps)
    assert jnp.allclose(y_train, y_train_ref, atol=1e-4, rtol=1e-4)

    batch_mean = jnp.mean(x, axis=(0, 2, 3))
    batch_var = jnp.var(x, axis=(0, 2, 3))            # biased, per reference module
    exp_rm = 0.9 * jnp.zeros((C,)) + 0.1 * batch_mean
    exp_rv = 0.9 * jnp.ones((C,)) + 0.1 * batch_var
    assert jnp.allclose(bn.running_mean, exp_rm, atol=1e-4, rtol=1e-4)
    assert jnp.allclose(bn.running_var, exp_rv, atol=1e-4, rtol=1e-4)

    bn.training = False
    y_eval = jax.block_until_ready(bn(x))
    y_eval_ref = _ref_batchnorm_eval(x, bn.running_mean, bn.running_var,
                                     bn.weight, bn.bias, bn.eps)
    assert jnp.allclose(y_eval, y_eval_ref, atol=1e-4, rtol=1e-4)
    assert bn.num_batches_tracked == 1
    assert y_train.shape == (N, C, H, W) and y_eval.shape == (N, C, H, W)

    # --- test 2: bf16 input, multi-step channel grid ---
    C2 = 32
    x2 = (jax.random.normal(jax.random.PRNGKey(1), (2, C2, 16, 16),
                            dtype=jnp.float32)).astype(jnp.bfloat16)
    bn2 = BatchNorm2d(num_features=C2)
    bn2.training = True
    y2 = jax.block_until_ready(bn2(x2))
    y2_ref = _ref_batchnorm_train(x2, bn2.weight, bn2.bias, bn2.eps)
    assert jnp.allclose(y2.astype(jnp.float32), y2_ref, atol=5e-2, rtol=5e-2)

    # --- test 3: two-pass fallback kernels (forced via a tiny budget) ---
    x_big = jax.random.normal(jax.random.PRNGKey(2), (2, 16, 256), jnp.float32)
    mean2, var2 = _batch_stats_two_pass(x_big, budget=1)
    assert jnp.allclose(mean2, jnp.mean(x_big, axis=(0, 2)), atol=1e-4, rtol=1e-4)
    assert jnp.allclose(var2, jnp.var(x_big, axis=(0, 2)), atol=1e-4, rtol=1e-4)
    sc = jnp.full((16, 1), 2.0, jnp.float32)
    sh = jnp.full((16, 1), -1.0, jnp.float32)
    y3 = jax.block_until_ready(_apply_scale_shift(x_big, sc, sh, budget=1))
    assert jnp.allclose(y3, x_big * 2.0 - 1.0, atol=1e-5, rtol=1e-5)

    print("KERNEL_OK")
</pallas_src>

<mosaic_0001>
module attributes {stable_mosaic.version = 11 : i64} {
  func.func @_bn_train_kernel(%arg0: i32, %arg1: memref<2x4x256xf32, #tpu.memory_space<vmem>>, %arg2: memref<4x1xf32, #tpu.memory_space<vmem>>, %arg3: memref<4x1xf32, #tpu.memory_space<vmem>>, %arg4: memref<2x4x256xf32, #tpu.memory_space<vmem>>, %arg5: memref<4x1xf32, #tpu.memory_space<vmem>>, %arg6: memref<4x1xf32, #tpu.memory_space<vmem>>) attributes {dimension_semantics = [#tpu.dimension_semantics<parallel>], iteration_bounds = array<i64: 1>, scalar_prefetch = 0 : i64, scratch_operands = 0 : i64, tpu.core_type = #tpu.core_type<tc>, window_params = [{transform_indices = @transform_0, window_bounds = array<i64: 2, 4, 256>}, {transform_indices = @transform_1, window_bounds = array<i64: 4, 1>}, {transform_indices = @transform_2, window_bounds = array<i64: 4, 1>}, {transform_indices = @transform_3, window_bounds = array<i64: 2, 4, 256>}, {transform_indices = @transform_4, window_bounds = array<i64: 4, 1>}, {transform_indices = @transform_5, window_bounds = array<i64: 4, 1>}]} {
    %c0 = arith.constant 0 : index
    %c0_0 = arith.constant 0 : index
    %c0_1 = arith.constant 0 : index
    %0 = vector.load %arg1[%c0, %c0_0, %c0_1] : memref<2x4x256xf32, #tpu.memory_space<vmem>>, vector<2x4x256xf32>
    %cst = arith.constant dense<0.000000e+00> : vector<4x256xf32>
    %1 = vector.multi_reduction <add>, %0, %cst [0] : vector<2x4x256xf32> to vector<4x256xf32>
    %cst_2 = arith.constant dense<0.000000e+00> : vector<4xf32>
    %2 = vector.multi_reduction <add>, %1, %cst_2 [1] : vector<4x256xf32> to vector<4xf32>
    %3 = vector.shape_cast %2 : vector<4xf32> to vector<4x1xf32>
    %4 = arith.mulf %0, %0 : vector<2x4x256xf32>
    %cst_3 = arith.constant dense<0.000000e+00> : vector<4x256xf32>
    %5 = vector.multi_reduction <add>, %4, %cst_3 [0] : vector<2x4x256xf32> to vector<4x256xf32>
    %cst_4 = arith.constant dense<0.000000e+00> : vector<4xf32>
    %6 = vector.multi_reduction <add>, %5, %cst_4 [1] : vector<4x256xf32> to vector<4xf32>
    %7 = vector.shape_cast %6 : vector<4xf32> to vector<4x1xf32>
    %cst_5 = arith.constant 0.001953125 : f32
    %8 = vector.broadcast %cst_5 : f32 to vector<4x1xf32>
    %9 = arith.mulf %3, %8 : vector<4x1xf32>
    %cst_6 = arith.constant 0.001953125 : f32
    %10 = vector.broadcast %cst_6 : f32 to vector<4x1xf32>
    %11 = arith.mulf %7, %10 : vector<4x1xf32>
    %12 = arith.mulf %9, %9 : vector<4x1xf32>
    %13 = arith.subf %11, %12 : vector<4x1xf32>
    %cst_7 = arith.constant 0.000000e+00 : f32
    %14 = vector.broadcast %cst_7 : f32 to vector<4x1xf32>
    %15 = arith.maximumf %13, %14 : vector<4x1xf32>
    %cst_8 = arith.constant 9.99999974E-6 : f32
    %16 = vector.broadcast %cst_8 : f32 to vector<4x1xf32>
    %17 = arith.addf %15, %16 : vector<4x1xf32>
    %18 = math.rsqrt %17 : vector<4x1xf32>
    %c0_9 = arith.constant 0 : index
    %c0_10 = arith.constant 0 : index
    %19 = vector.load %arg2[%c0_9, %c0_10] : memref<4x1xf32, #tpu.memory_space<vmem>>, vector<4x1xf32>
    %20 = arith.mulf %19, %18 : vector<4x1xf32>
    %c0_11 = arith.constant 0 : index
    %c0_12 = arith.constant 0 : index
    %21 = vector.load %arg3[%c0_11, %c0_12] : memref<4x1xf32, #tpu.memory_space<vmem>>, vector<4x1xf32>
    %22 = arith.mulf %9, %20 : vector<4x1xf32>
    %23 = arith.subf %21, %22 : vector<4x1xf32>
    %24 = vector.shape_cast %20 : vector<4x1xf32> to vector<1x4x1xf32>
    %25 = vector.broadcast %24 : vector<1x4x1xf32> to vector<2x4x256xf32>
    %26 = arith.mulf %0, %25 : vector<2x4x256xf32>
    %27 = vector.shape_cast %23 : vector<4x1xf32> to vector<1x4x1xf32>
    %28 = vector.broadcast %27 : vector<1x4x1xf32> to vector<2x4x256xf32>
    %29 = arith.addf %26, %28 : vector<2x4x256xf32>
    %c0_13 = arith.constant 0 : index
    %c0_14 = arith.constant 0 : index
    %c0_15 = arith.constant 0 : index
    %30 = vector.load %arg4[%c0_13, %c0_14, %c0_15] : memref<2x4x256xf32, #tpu.memory_space<vmem>>, vector<2x4x256xf32>
    tpu.vector_store %arg4[%c0_13, %c0_14, %c0_15], %29 {strides = array<i32>} : memref<2x4x256xf32, #tpu.memory_space<vmem>>, vector<2x4x256xf32>,
    %c0_16 = arith.constant 0 : index
    %c0_17 = arith.constant 0 : index
    %31 = vector.load %arg5[%c0_16, %c0_17] : memref<4x1xf32, #tpu.memory_space<vmem>>, vector<4x1xf32>
    tpu.vector_store %arg5[%c0_16, %c0_17], %9 {strides = array<i32>} : memref<4x1xf32, #tpu.memory_space<vmem>>, vector<4x1xf32>,
    %c0_18 = arith.constant 0 : index
    %c0_19 = arith.constant 0 : index
    %32 = vector.load %arg6[%c0_18, %c0_19] : memref<4x1xf32, #tpu.memory_space<vmem>>, vector<4x1xf32>
    tpu.vector_store %arg6[%c0_18, %c0_19], %15 {strides = array<i32>} : memref<4x1xf32, #tpu.memory_space<vmem>>, vector<4x1xf32>,
    return
  }
  func.func @transform_0(%arg0: i32) -> (i32, i32, i32) {
    %c0_i32 = arith.constant 0 : i32
    %c0_i32_0 = arith.constant 0 : i32
    %c0_i32_1 = arith.constant 0 : i32
    return %c0_i32, %arg0, %c0_i32_0 : i32, i32, i32
  }
  func.func @transform_1(%arg0: i32) -> (i32, i32) {
    %c0_i32 = arith.constant 0 : i32
    %c0_i32_0 = arith.constant 0 : i32
    return %arg0, %c0_i32 : i32, i32
  }
  func.func @transform_2(%arg0: i32) -> (i32, i32) {
    %c0_i32 = arith.constant 0 : i32
    %c0_i32_0 = arith.constant 0 : i32
    return %arg0, %c0_i32 : i32, i32
  }
  func.func @transform_3(%arg0: i32) -> (i32, i32, i32) {
    %c0_i32 = arith.constant 0 : i32
    %c0_i32_0 = arith.constant 0 : i32
    %c0_i32_1 = arith.constant 0 : i32
    return %c0_i32, %arg0, %c0_i32_0 : i32, i32, i32
  }
  func.func @transform_4(%arg0: i32) -> (i32, i32) {
    %c0_i32 = arith.constant 0 : i32
    %c0_i32_0 = arith.constant 0 : i32
    return %arg0, %c0_i32 : i32, i32
  }
  func.func @transform_5(%arg0: i32) -> (i32, i32) {
    %c0_i32 = arith.constant 0 : i32
    %c0_i32_0 = arith.constant 0 : i32
    return %arg0, %c0_i32 : i32, i32
  }
}

</mosaic_0001>

<bundles_post_ra>
// kernel: _bn_train_forward.1
= control target key start
LH: loop header
LB: loop body
LE: loop exit
PB: predicated region body
PF: predicated region fallthrough
CT: control target
= control target key end

     0   :  { %vm25_vm0 = vcmask 1043456   ;;  %v121_v26 = vmov 0   ;;  %vm98_vm1 = vcmask 3072   ;;  %v122_v41 = vmov 839922192   ;;  %s205_s0 = inlined_call_operand.vmem [shape: f32[2,4,256], index: 0, kind: input, shape index: {}]   ;;  %s206_s4 = inlined_call_operand.vmem [shape: f32[4,1], index: 4, kind: output, shape index: {1}]   ;;  %s207_s5 = inlined_call_operand.vmem [shape: f32[4,1], index: 5, kind: output, shape index: {2}]   ;;  %s208_s1 = inlined_call_operand.vmem [shape: f32[4,1], index: 1, kind: input, shape index: {}]   ;;  %s209_s2 = inlined_call_operand.vmem [shape: f32[4,1], index: 2, kind: input, shape index: {}]   ;;  %s210_s3 = inlined_call_operand.vmem [shape: f32[2,4,256], index: 3, kind: output, shape index: {0}]  }
   0x1   :  { %v156_v0 = vld [vmem:[%s205_s0] sm:$0xff]  ;;  %v161_v1 = vld [vmem:[%s205_s0 + $0x8] sm:$0xff]  ;;  %115 = vset.pattern.permute.xlu1 %v121_v26  ;;  %116 = vset.pattern.permute.xlu0 %v121_v26  ;;  %v73_v42 = vunpack.c.l.s4 %v122_v41  ;;  %v75_v43 = vlaneseq }
   0x2   :  { %v21_v2 = vcombine.high %v156_v0, %v156_v0  ;;  %v22_v3 = vcombine.high %v161_v1, %v161_v1  ;;  %v26_v4 = vsel %vm25_vm0, %v156_v0, 0.0  ;;  %v27_v5 = vsel %vm25_vm0, %v161_v1, 0.0  ;;  %v63_v35 = vld [vmem:[%s208_s1] sm:$0xf] }
   0x3   :  { %v28_v6 = vadd.f32 %v27_v5, %v26_v4  ;;  %v37_v7 = vmul.f32 %v156_v0, %v156_v0  ;;  %v38_v8 = vmul.f32 %v161_v1, %v161_v1  ;;  %v65_v38 = vld [vmem:[%s209_s2] sm:$0xf]  ;;  %v74_v44 = vunpack.c.0.s8 %v73_v42 }
   0x4   :  { %v29_v9 = vsel %vm25_vm0, %v21_v2, 0.0  ;;  %v30_v10 = vsel %vm25_vm0, %v22_v3, 0.0  ;;  %v76_v45 = vshrl.u32 %v75_v43, 7 }
   0x5   :  { %v31_v11 = vadd.f32 %v30_v10, %v29_v9  ;;  %v32_v12 = vsel %vm25_vm0, %v28_v6, 0.0  ;;  %v41_v13 = vcombine.high %v37_v7, %v37_v7  ;;  %v42_v14 = vcombine.high %v38_v8, %v38_v8 }
   0x6   :  { %v45_v15 = vsel %vm25_vm0, %v37_v7, 0.0  ;;  %v46_v16 = vsel %vm25_vm0, %v38_v8, 0.0  ;;  %v77_v46 = vsub.s32 %v74_v44, %v76_v45 }
   0x7   :  { %v33_v17 = vsel %vm25_vm0, %v31_v11, 0.0  ;;  %v47_v18 = vadd.f32 %v46_v16, %v45_v15  ;;  %v48_v19 = vsel %vm25_vm0, %v41_v13, 0.0  ;;  %v49_v20 = vsel %vm25_vm0, %v42_v14, 0.0 }
   0x8   :  { %v34_v21 = vadd.f32 %v33_v17, %v32_v12  ;;  %v50_v22 = vadd.f32 %v49_v20, %v48_v19 }
   0x9   :  { %v51_v23 = vsel %vm25_vm0, %v47_v18, 0.0 }
   0xa   :  { %35 = vadd.xlane.f32.xlu0 %v34_v21  ;;  %v52_v24 = vsel %vm25_vm0, %v50_v22, 0.0 }
   0xb   :  { %v53_v25 = vadd.f32 %v52_v24, %v51_v23 }
   0xe   :  { %54 = vadd.xlane.f32.xlu0 %v53_v25 }
  0x93   :  { %v36_v27 = vpop.xlane.xlu0 %35 }
  0x94   :  { %v56_v28 = vmul.f32 0.001953125, %v36_v27 }
  0x96   :  { %99 = vst.msk [vmem:[%s206_s4] sm:$0xf] %vm98_vm1, %v56_v28  ;;  %v58_v30 = vmul.f32 %v56_v28, %v56_v28 }
  0x97   :  { %v55_v29 = vpop.xlane.xlu0 %54 }
  0x98   :  { %v57_v31 = vmul.f32 0.001953125, %v55_v29 }
  0x9a   :  { %v59_v32 = vsub.f32 %v57_v31, %v58_v30 }
  0x9c   :  { %v60_v33 = vmax.f32 %v59_v32, 0.0 }
  0x9e   :  { %v61_v34 = vadd.f32 1e-05, %v60_v33  ;;  %100 = vst.msk [vmem:[%s207_s5] sm:$0xf] %vm98_vm1, %v60_v33 }
  0xa0   :  { %119 = vrsqrt.f32 %v61_v34 }
  0xad   :  { %v120_v36 = vpop.eup %119 }
  0xae   :  { %v64_v37 = vmul.f32 %v120_v36, %v63_v35 }
  0xb0   :  { %70 = vperm.xlu1 %115, %v64_v37   ;;  %v66_v39 = vmul.f32 %v64_v37, %v56_v28 }
  0xb2   :  { %v67_v40 = vsub.f32 %v65_v38, %v66_v39 }
  0xb4   :  { %84 = vperm.xlu1 %115, %v67_v40  }
 0x12b   :  { %v71_v47 = vpop.permute.xlu1 %70 }
 0x12c   :  { %v78_v48 = vrot.slane %v71_v47, %v77_v46 }
 0x12e   :  { %v80_v50 = vmul.f32 %v78_v48, %v156_v0  ;;  %v81_v51 = vmul.f32 %v78_v48, %v161_v1 }
 0x12f   :  { %v85_v49 = vpop.permute.xlu1 %84 }
 0x130   :  { %v92_v52 = vrot.slane %v85_v49, %v77_v46 }
 0x132   :  { %v94_v53 = vadd.f32 %v92_v52, %v80_v50  ;;  %v95_v54 = vadd.f32 %v92_v52, %v81_v51 }
 0x134   :  { %96 = vst [vmem:[%s210_s3] sm:$0xff] %v94_v53  ;;  %97 = vst [vmem:[%s210_s3 + $0x8] sm:$0xff] %v95_v54 }

</bundles_post_ra>
